<compile_context>
chip_gen: v7x
topology: tpu7x:2x2x1
jax: 0.10.0
libtpu: 0.0.40
codegen_flags: <defaults>
</compile_context>

<pallas_src>
import functools

import jax
import jax.numpy as jnp
from jax.experimental import pallas as pl
from jax.experimental.pallas import tpu as pltpu


def _round_up(x: int, m: int) -> int:
    return ((x + m - 1) // m) * m


def _vmem_cap_bytes() -> int:
    """Generation-aware VMEM limit: ~80% of per-core capacity, safe fallback."""
    try:
        cap = int(pltpu.get_tpu_info().vmem_capacity_bytes)
    except Exception:
        cap = 64 << 20  # conservative: v7x per-TensorCore VMEM
    return max(int(cap * 0.8), 16 << 20)


def _choose_batch_tile(B: int) -> int:
    """Sublane-aligned batch tile. Prefer >=2 grid steps (v7x megacore) and
    tall tiles that fill the MXU rows / amortize per-grid-step overhead."""
    b8 = _round_up(B, 8)
    if b8 <= 8:
        return b8                       # tiny batch: single 8-row tile
    if b8 <= 512:
        # Split into two grid steps so "parallel" shards across both TCs.
        return _round_up(pl.cdiv(b8, 2), 8)
    # Large batches: 512-row tiles (multiple of 256 -> fills the 256-row MXU
    # on v6e/v7x, also fine on v5e's 128-row MXU), several pipelined steps.
    return 512


def _mlp_kernel(*refs, n_layers: int):
    """Fused x -> [Linear -> Tanh]*(n-1) -> Linear on one VMEM-resident batch tile."""
    x_ref = refs[0]
    o_ref = refs[-1]
    wb_refs = refs[1:-1]  # w0, b0, w1, b1, ...
    h = x_ref[...].astype(jnp.float32)
    for i in range(n_layers):
        w = wb_refs[2 * i][...]                              # (Din_pad, Dout_pad)
        b = wb_refs[2 * i + 1][...].astype(jnp.float32)      # (1, Dout_pad)
        lhs = h.astype(w.dtype) if w.dtype != jnp.float32 else h
        # MXU matmul, always f32 accumulation; bias add + tanh stay in f32.
        h = jnp.dot(lhs, w, preferred_element_type=jnp.float32) + b
        if i < n_layers - 1:
            h = jnp.tanh(h)
    o_ref[...] = h.astype(o_ref.dtype)


def init_mlp_params(key, sizes, dtype=jnp.float32):
    """Matches nn.Linear init: U(-1/sqrt(fan_in), 1/sqrt(fan_in)); weight stored (out, in)."""
    params = []
    for i in range(len(sizes) - 1):
        fan_in, fan_out = sizes[i], sizes[i + 1]
        key, kw, kb = jax.random.split(key, 3)
        bound = 1.0 / jnp.sqrt(jnp.asarray(fan_in, dtype))
        w = jax.random.uniform(kw, (fan_out, fan_in), dtype, -bound, bound)
        b = jax.random.uniform(kb, (fan_out,), dtype, -bound, bound)
        params.append((w, b))
    return params


def prepare_params(params, lane=128, compute_dtype=jnp.float32):
    """One-time prep: transpose (out,in)->(in,out), zero-pad feature dims to
    multiples of 128 (lane-dense MXU tiles / unmasked stores), and optionally
    store weights in bf16 for the fast MXU path (biases stay f32). Padding is
    exact: padded input columns hit zero weight rows, padded output columns
    get zero bias and tanh(0)=0, so real outputs are unchanged."""
    prepped = []
    for w, b in params:
        dout, din = w.shape
        din_p, dout_p = _round_up(din, lane), _round_up(dout, lane)
        w_t = (jnp.zeros((din_p, dout_p), jnp.float32)
               .at[:din, :dout].set(w.astype(jnp.float32).T)
               .astype(compute_dtype))
        b_p = jnp.zeros((1, dout_p), jnp.float32).at[0, :dout].set(b.astype(jnp.float32))
        prepped.append((w_t, b_p))
    return prepped


@functools.partial(jax.jit, static_argnames=("out_features",))
def mlp_forward(x, prepped_params, out_features):
    """x: (B, Din).  prepped_params: list of (w_t_pad (Din_p,Dout_p), b_pad (1,Dout_p))."""
    B, Din = x.shape
    n_layers = len(prepped_params)
    din_pad = prepped_params[0][0].shape[0]
    dout_pad = prepped_params[-1][0].shape[1]
    act_itemsize = 4  # x / activations / out are f32

    tb = _choose_batch_tile(B)
    b_pad = _round_up(B, tb)

    # Skip the wrapper-side re-pad (an extra un-hidden HBM round trip of x)
    # when the input is already tile-aligned.
    if b_pad == B and din_pad == Din:
        x_p = x
    else:
        x_p = jnp.zeros((b_pad, din_pad), x.dtype).at[:B, :Din].set(x)

    resident = pl.Buffered(1)  # constant index_map -> single-buffer the weights
    flat_wb = []
    in_specs = [pl.BlockSpec((tb, din_pad), lambda i: (i, 0))]
    for w_t, b in prepped_params:
        flat_wb += [w_t, b]
        in_specs.append(pl.BlockSpec(w_t.shape, lambda i: (0, 0), pipeline_mode=resident))
        in_specs.append(pl.BlockSpec(b.shape, lambda i: (0, 0), pipeline_mode=resident))
    out_specs = pl.BlockSpec((tb, dout_pad), lambda i: (i, 0))

    # Cost hint for XLA scheduling (padded counts -- harmless as a hint).
    flops = 0
    transcendentals = 0
    bytes_accessed = (b_pad * din_pad + b_pad * dout_pad) * act_itemsize
    for idx, (w_t, b) in enumerate(prepped_params):
        flops += 2 * b_pad * w_t.shape[0] * w_t.shape[1]
        if idx < n_layers - 1:
            transcendentals += b_pad * w_t.shape[1]
        bytes_accessed += w_t.size * w_t.dtype.itemsize + b.size * b.dtype.itemsize

    # VMEM budget: double-buffered x/out batch tiles + single-buffered resident
    # weights/biases + materialized inter-layer activation + headroom, capped
    # at a generation-aware fraction of per-core VMEM.
    max_feat_pad = max(max(w.shape[1] for w, _ in prepped_params), din_pad)
    vmem_bytes = 2 * (tb * din_pad + tb * dout_pad) * act_itemsize
    vmem_bytes += sum(w.size * w.dtype.itemsize + b.size * b.dtype.itemsize
                      for w, b in prepped_params)
    vmem_bytes += 2 * tb * max_feat_pad * act_itemsize  # inter-layer h spill
    vmem_bytes = min(max(vmem_bytes + (2 << 20), 4 << 20), _vmem_cap_bytes())

    out = pl.pallas_call(
        functools.partial(_mlp_kernel, n_layers=n_layers),
        out_shape=jax.ShapeDtypeStruct((b_pad, dout_pad), x.dtype),
        grid=(b_pad // tb,),
        in_specs=in_specs,
        out_specs=out_specs,
        compiler_params=pltpu.CompilerParams(
            dimension_semantics=("parallel",),
            vmem_limit_bytes=vmem_bytes,
        ),
        cost_estimate=pl.CostEstimate(
            flops=flops,
            transcendentals=transcendentals,
            bytes_accessed=bytes_accessed,
        ),
    )(x_p, *flat_wb)
    return out[:B, :out_features]


def mlp_reference(x, params):
    n = len(params)
    h = x
    for i, (w, b) in enumerate(params):
        h = h @ w.T + b
        if i < n - 1:
            h = jnp.tanh(h)
    return h


if __name__ == "__main__":
    key = jax.random.PRNGKey(0)
    sizes = (32, 64, 48, 16)  # MLP(sizes): Linear(32,64), Tanh, Linear(64,48), Tanh, Linear(48,16)
    batch = 8

    kx, kp = jax.random.split(key)
    x = jax.random.normal(kx, (batch, sizes[0]), jnp.float32)
    params = init_mlp_params(kp, sizes)
    ref = mlp_reference(x, params)

    # Exact f32 path (bit-for-bit PyTorch nn.Linear semantics).
    prepped_f32 = prepare_params(params)
    out = jax.block_until_ready(mlp_forward(x, prepped_f32, sizes[-1]))
    assert out.shape == (batch, sizes[-1])
    assert jnp.allclose(out, ref, atol=2e-5, rtol=2e-5), "f32 mismatch vs reference"

    # bf16-weight MXU path (f32 accumulation) -- looser tolerance by design.
    prepped_bf16 = prepare_params(params, compute_dtype=jnp.bfloat16)
    out_bf16 = jax.block_until_ready(mlp_forward(x, prepped_bf16, sizes[-1]))
    assert out_bf16.shape == (batch, sizes[-1])
    assert jnp.allclose(out_bf16, ref, atol=5e-2, rtol=5e-2), "bf16 mismatch vs reference"

    print("KERNEL_OK")
</pallas_src>

<mosaic_0001>
module attributes {stable_mosaic.version = 11 : i64} {
  func.func @_mlp_kernel(%arg0: i32, %arg1: memref<8x128xf32, #tpu.memory_space<vmem>>, %arg2: memref<128x128xf32, #tpu.memory_space<vmem>>, %arg3: memref<1x128xf32, #tpu.memory_space<vmem>>, %arg4: memref<128x128xf32, #tpu.memory_space<vmem>>, %arg5: memref<1x128xf32, #tpu.memory_space<vmem>>, %arg6: memref<128x128xf32, #tpu.memory_space<vmem>>, %arg7: memref<1x128xf32, #tpu.memory_space<vmem>>, %arg8: memref<8x128xf32, #tpu.memory_space<vmem>>) attributes {dimension_semantics = [#tpu.dimension_semantics<parallel>], iteration_bounds = array<i64: 1>, scalar_prefetch = 0 : i64, scratch_operands = 0 : i64, tpu.core_type = #tpu.core_type<tc>, window_params = [{transform_indices = @transform_0, window_bounds = array<i64: 8, 128>}, {pipeline_mode = #tpu.pipeline_mode<synchronous>, transform_indices = @transform_1, window_bounds = array<i64: 128, 128>}, {pipeline_mode = #tpu.pipeline_mode<synchronous>, transform_indices = @transform_2, window_bounds = array<i64: 1, 128>}, {pipeline_mode = #tpu.pipeline_mode<synchronous>, transform_indices = @transform_3, window_bounds = array<i64: 128, 128>}, {pipeline_mode = #tpu.pipeline_mode<synchronous>, transform_indices = @transform_4, window_bounds = array<i64: 1, 128>}, {pipeline_mode = #tpu.pipeline_mode<synchronous>, transform_indices = @transform_5, window_bounds = array<i64: 128, 128>}, {pipeline_mode = #tpu.pipeline_mode<synchronous>, transform_indices = @transform_6, window_bounds = array<i64: 1, 128>}, {transform_indices = @transform_7, window_bounds = array<i64: 8, 128>}]} {
    %c0 = arith.constant 0 : index
    %c0_0 = arith.constant 0 : index
    %0 = vector.load %arg1[%c0, %c0_0] : memref<8x128xf32, #tpu.memory_space<vmem>>, vector<8x128xf32>
    %c0_1 = arith.constant 0 : index
    %c0_2 = arith.constant 0 : index
    %1 = vector.load %arg2[%c0_1, %c0_2] : memref<128x128xf32, #tpu.memory_space<vmem>>, vector<128x128xf32>
    %c0_3 = arith.constant 0 : index
    %c0_4 = arith.constant 0 : index
    %2 = vector.load %arg3[%c0_3, %c0_4] : memref<1x128xf32, #tpu.memory_space<vmem>>, vector<1x128xf32>
    %cst = arith.constant dense<0.000000e+00> : vector<8x128xf32>
    %3 = tpu.matmul %0, %1, %cst {dimension_numbers = #tpu.dot_dimension_numbers<[1], [0], [0], [1], [0, 0, 1, 1], [], []>} : vector<8x128xf32>, vector<128x128xf32>, vector<8x128xf32> -> vector<8x128xf32>
    %4 = vector.broadcast %2 : vector<1x128xf32> to vector<8x128xf32>
    %5 = arith.addf %3, %4 : vector<8x128xf32>
    %6 = math.tanh %5 : vector<8x128xf32>
    %c0_5 = arith.constant 0 : index
    %c0_6 = arith.constant 0 : index
    %7 = vector.load %arg4[%c0_5, %c0_6] : memref<128x128xf32, #tpu.memory_space<vmem>>, vector<128x128xf32>
    %c0_7 = arith.constant 0 : index
    %c0_8 = arith.constant 0 : index
    %8 = vector.load %arg5[%c0_7, %c0_8] : memref<1x128xf32, #tpu.memory_space<vmem>>, vector<1x128xf32>
    %cst_9 = arith.constant dense<0.000000e+00> : vector<8x128xf32>
    %9 = tpu.matmul %6, %7, %cst_9 {dimension_numbers = #tpu.dot_dimension_numbers<[1], [0], [0], [1], [0, 0, 1, 1], [], []>} : vector<8x128xf32>, vector<128x128xf32>, vector<8x128xf32> -> vector<8x128xf32>
    %10 = vector.broadcast %8 : vector<1x128xf32> to vector<8x128xf32>
    %11 = arith.addf %9, %10 : vector<8x128xf32>
    %12 = math.tanh %11 : vector<8x128xf32>
    %c0_10 = arith.constant 0 : index
    %c0_11 = arith.constant 0 : index
    %13 = vector.load %arg6[%c0_10, %c0_11] : memref<128x128xf32, #tpu.memory_space<vmem>>, vector<128x128xf32>
    %c0_12 = arith.constant 0 : index
    %c0_13 = arith.constant 0 : index
    %14 = vector.load %arg7[%c0_12, %c0_13] : memref<1x128xf32, #tpu.memory_space<vmem>>, vector<1x128xf32>
    %cst_14 = arith.constant dense<0.000000e+00> : vector<8x128xf32>
    %15 = tpu.matmul %12, %13, %cst_14 {dimension_numbers = #tpu.dot_dimension_numbers<[1], [0], [0], [1], [0, 0, 1, 1], [], []>} : vector<8x128xf32>, vector<128x128xf32>, vector<8x128xf32> -> vector<8x128xf32>
    %16 = vector.broadcast %14 : vector<1x128xf32> to vector<8x128xf32>
    %17 = arith.addf %15, %16 : vector<8x128xf32>
    %c0_15 = arith.constant 0 : index
    %c0_16 = arith.constant 0 : index
    %18 = vector.load %arg8[%c0_15, %c0_16] : memref<8x128xf32, #tpu.memory_space<vmem>>, vector<8x128xf32>
    tpu.vector_store %arg8[%c0_15, %c0_16], %17 {strides = array<i32>} : memref<8x128xf32, #tpu.memory_space<vmem>>, vector<8x128xf32>,
    return
  }
  func.func @transform_0(%arg0: i32) -> (i32, i32) {
    %c0_i32 = arith.constant 0 : i32
    %c0_i32_0 = arith.constant 0 : i32
    return %arg0, %c0_i32 : i32, i32
  }
  func.func @transform_1(%arg0: i32) -> (i32, i32) {
    %c0_i32 = arith.constant 0 : i32
    %c0_i32_0 = arith.constant 0 : i32
    %c0_i32_1 = arith.constant 0 : i32
    return %c0_i32, %c0_i32_0 : i32, i32
  }
  func.func @transform_2(%arg0: i32) -> (i32, i32) {
    %c0_i32 = arith.constant 0 : i32
    %c0_i32_0 = arith.constant 0 : i32
    %c0_i32_1 = arith.constant 0 : i32
    return %c0_i32, %c0_i32_0 : i32, i32
  }
  func.func @transform_3(%arg0: i32) -> (i32, i32) {
    %c0_i32 = arith.constant 0 : i32
    %c0_i32_0 = arith.constant 0 : i32
    %c0_i32_1 = arith.constant 0 : i32
    return %c0_i32, %c0_i32_0 : i32, i32
  }
  func.func @transform_4(%arg0: i32) -> (i32, i32) {
    %c0_i32 = arith.constant 0 : i32
    %c0_i32_0 = arith.constant 0 : i32
    %c0_i32_1 = arith.constant 0 : i32
    return %c0_i32, %c0_i32_0 : i32, i32
  }
  func.func @transform_5(%arg0: i32) -> (i32, i32) {
    %c0_i32 = arith.constant 0 : i32
    %c0_i32_0 = arith.constant 0 : i32
    %c0_i32_1 = arith.constant 0 : i32
    return %c0_i32, %c0_i32_0 : i32, i32
  }
  func.func @transform_6(%arg0: i32) -> (i32, i32) {
    %c0_i32 = arith.constant 0 : i32
    %c0_i32_0 = arith.constant 0 : i32
    %c0_i32_1 = arith.constant 0 : i32
    return %c0_i32, %c0_i32_0 : i32, i32
  }
  func.func @transform_7(%arg0: i32) -> (i32, i32) {
    %c0_i32 = arith.constant 0 : i32
    %c0_i32_0 = arith.constant 0 : i32
    return %arg0, %c0_i32 : i32, i32
  }
}

</mosaic_0001>

<bundles_post_ra>
// kernel: mlp_forward.1
= control target key start
LH: loop header
LB: loop body
LE: loop exit
PB: predicated region body
PF: predicated region fallthrough
CT: control target
= control target key end

     0   :  { %12 = vsyncpa [#allocation3], 0  ;;  %s860_s0 = inlined_call_operand.vmem [shape: f32[8,128], index: 0, kind: input, shape index: {}]   ;;  %s861_s1 = inlined_call_operand.hbm [shape: f32[128,128], index: 1, kind: input, shape index: {}]   ;;  %s862_s2 = inlined_call_operand.vmem [shape: f32[1,128], index: 2, kind: input, shape index: {}]   ;;  %s863_s3 = inlined_call_operand.hbm [shape: f32[128,128], index: 3, kind: input, shape index: {}]   ;;  %s864_s4 = inlined_call_operand.vmem [shape: f32[1,128], index: 4, kind: input, shape index: {}]   ;;  %s865_s5 = inlined_call_operand.hbm [shape: f32[128,128], index: 5, kind: input, shape index: {}]   ;;  %s866_s6 = inlined_call_operand.vmem [shape: f32[1,128], index: 6, kind: input, shape index: {}]   ;;  %s867_s7 = inlined_call_operand.hbm [shape: f32[8,128], index: 7, kind: output, shape index: {}]  }
   0x1   :  { %13 = vsyncpa [#allocation6], 0 }
   0x2   :  { %14 = vsyncpa [#allocation4], 0  ;;  %s705_s24 = smov [#allocation5]   ;;  %s706_s26 = smov [#allocation2]  }
   0x3   :  { %s36_s25 = sshll.u32 %s705_s24, 4  ;;  %s22_s27 = sshll.u32 %s706_s26, 4  ;;  %s37_s25 = int_to_ptr.vmem [resolvable:$true] %s36_s25  ;;  %s754_s27 = int_to_ptr.vmem [resolvable:$true] %s22_s27 }
   0x4   :  { %s611_s30 = scalar_lea.hbm %s863_s3, 2048 }
   0x5   :  { %p612_p0 = scmp.ne.s32.totalorder %s863_s3, %s611_s30  ;;  %p615_p1 = scmp.lt.u32.totalorder %s611_s30, %s863_s3 }
   0x7   :  { %p617_p2 = pnand %p615_p1, %p612_p0 }
   0x9   :  { %620 = shalt.err (!%p617_p2)
}
   0xa   :  { %s621_s12 = scalar_lea.vmem %s37_s25, 2048  ;;  %p626_p4 = scmp.lt.s32.totalorder %s37_s25, %s37_s25 }
   0xb   :  { %p622_p3 = scmp.ne.s32.totalorder %s37_s25, %s621_s12  ;;  %p627_p5 = scmp.lt.s32.totalorder %s621_s12, %s621_s12 }
   0xd   :  { %p628_p6 = por %p627_p5, %p626_p4 }
   0xf   :  { %p629_p7 = pnand %p628_p6, %p622_p3 }
  0x11   :  { %632 = shalt.err (!%p629_p7)
}
  0x12   :  { %s707_s13 = smov 128   ;;  %s708_s14 = smov 8  }
  0x13   :  { %42 = dma.hbm_to_vmem [thread:$0]  %s863_s3, 2048, %s37_s25, [#allocation6], %s707_s13, %s707_s13, %s708_s14  }
  0x14   :  { %s633_s19 = scalar_lea.hbm %s861_s1, 2048 }
  0x15   :  { %p634_p8 = scmp.ne.s32.totalorder %s861_s1, %s633_s19  ;;  %p637_p9 = scmp.lt.u32.totalorder %s633_s19, %s861_s1 }
  0x17   :  { %p639_p10 = pnand %p637_p9, %p634_p8 }
  0x19   :  { %642 = shalt.err (!%p639_p10)
}
  0x1a   :  { %s643_s24 = scalar_lea.vmem %s754_s27, 2048  ;;  %p648_p12 = scmp.lt.s32.totalorder %s754_s27, %s754_s27 }
  0x1b   :  { %p644_p11 = scmp.ne.s32.totalorder %s754_s27, %s643_s24  ;;  %p649_p13 = scmp.lt.s32.totalorder %s643_s24, %s643_s24 }
  0x1d   :  { %p650_p0 = por %p649_p13, %p648_p12 }
  0x1f   :  { %p651_p1 = pnand %p650_p0, %p644_p11 }
  0x21   :  { %654 = shalt.err (!%p651_p1)
}
  0x22   :  { %28 = dma.hbm_to_vmem [thread:$0]  %s861_s1, 2048, %s754_s27, [#allocation3], %s707_s13, %s707_s13, %s708_s14  }
  0x23   :  { %s709_s26 = smov [#allocation7]   ;;  %s655_s8 = scalar_lea.hbm %s865_s5, 2048 }
  0x24   :  { %s50_s28 = sshll.u32 %s709_s26, 4  ;;  %p656_p2 = scmp.ne.s32.totalorder %s865_s5, %s655_s8  ;;  %s51_s28 = int_to_ptr.vmem [resolvable:$true] %s50_s28 }
  0x25   :  { %p659_p3 = scmp.lt.u32.totalorder %s655_s8, %s865_s5 }
  0x27   :  { %p661_p4 = pnand %p659_p3, %p656_p2 }
  0x29   :  { %664 = shalt.err (!%p661_p4)
}
  0x2a   :  { %s665_s15 = scalar_lea.vmem %s51_s28, 2048  ;;  %p670_p6 = scmp.lt.s32.totalorder %s51_s28, %s51_s28 }
  0x2b   :  { %p666_p5 = scmp.ne.s32.totalorder %s51_s28, %s665_s15  ;;  %p671_p7 = scmp.lt.s32.totalorder %s665_s15, %s665_s15 }
  0x2d   :  { %p672_p8 = por %p671_p7, %p670_p6 }
  0x2f   :  { %p673_p9 = pnand %p672_p8, %p666_p5 }
  0x31   :  { %676 = shalt.err (!%p673_p9)
}
  0x32   :  { %56 = dma.hbm_to_vmem [thread:$0]  %s865_s5, 2048, %s51_s28, [#allocation6], %s707_s13, %s707_s13, %s708_s14  }
  0x33   :  { %699 = dma.done.wait [#allocation3], 2048  }
  0x34   :  { %700 = vsyncadd [#allocation3], 4294965248 }
  0x35   :  { %701 = dma.done.wait [#allocation6], 4096  }
  0x36   :  { %702 = vsyncadd [#allocation6], 4294963200  ;;  %v710_v0 = vmov 0.0|0.0   ;;  %vm711_vm0 = vmmov 0   ;;  %v712_v1 = vmov 0.0   ;;  %v69_v2 = vld [vmem:[#allocation2] sm:$0xff] }
  0x37   :  { %526 = vmatprep.subr.bf16.mxu0 %v710_v0  ;;  %453 = vmatprep.mubr.msk.f32.mxu0 %vm711_vm0, %v712_v1  ;;  %v70_v3 = vld [vmem:[#allocation2 + $0x8] sm:$0xff]  ;;  %v71_v4 = vld [vmem:[#allocation2 + $0x10] sm:$0xff]  ;;  %v72_v6 = vld [vmem:[#allocation2 + $0x18] sm:$0xff]  ;;  %s713_s19 = smov [#allocation8]  }
  0x38   :  { %550 = vmatprep.subr.bf16.mxu1 %v710_v0  ;;  %488 = vmatprep.mubr.msk.f32.mxu1 %vm711_vm0, %v712_v1  ;;  %v527_v5 = vpack.c.bf16 %v70_v3, %v69_v2  ;;  %v530_v7 = vpack.c.bf16 %v72_v6, %v71_v4  ;;  %v73_v8 = vld [vmem:[#allocation2 + $0x20] sm:$0xff]  ;;  %v74_v9 = vld [vmem:[#allocation2 + $0x28] sm:$0xff]  ;;  %v165_v12 = vld [vmem:[#allocation5 + $0x10] sm:$0xff]  ;;  %s357_s20 = sshll.u32 %s713_s19, 4  ;;  %s358_s20 = int_to_ptr.vmem [resolvable:$true] %s357_s20 }
  0x39   :  { %v163_v10 = vld [vmem:[#allocation5] sm:$0xff]  ;;  %v164_v11 = vld [vmem:[#allocation5 + $0x8] sm:$0xff]  ;;  %v166_v13 = vld [vmem:[#allocation5 + $0x18] sm:$0xff]  ;;  %v533_v14 = vpack.c.bf16 %v74_v9, %v73_v8  ;;  %s677_s21 = scalar_lea.vmem %s358_s20, 128  ;;  %p682_p11 = scmp.lt.s32.totalorder %s358_s20, %s358_s20 }
  0x3a   :  { %528 = vmatpush3.bf16.msra.mxu0 %v527_v5  ;;  %v551_v15 = vpack.c.bf16 %v164_v11, %v163_v10  ;;  %v75_v16 = vld [vmem:[#allocation2 + $0x30] sm:$0xff]  ;;  %v76_v17 = vld [vmem:[#allocation2 + $0x38] sm:$0xff]  ;;  %v554_v18 = vpack.c.bf16 %v166_v13, %v165_v12  ;;  %v167_v19 = vld [vmem:[#allocation5 + $0x20] sm:$0xff]  ;;  %p678_p10 = scmp.ne.s32.totalorder %s358_s20, %s677_s21  ;;  %p683_p12 = scmp.lt.s32.totalorder %s677_s21, %s677_s21 }
  0x3b   :  { %529 = vmatprep.subr.bf16.mxu0 %v710_v0  ;;  %v168_v20 = vld [vmem:[#allocation5 + $0x28] sm:$0xff]  ;;  %v536_v21 = vpack.c.bf16 %v76_v17, %v75_v16  ;;  %v77_v22 = vld [vmem:[#allocation2 + $0x40] sm:$0xff]  ;;  %v169_v25 = vld [vmem:[#allocation5 + $0x30] sm:$0xff] }
  0x3c   :  { %552 = vmatpush3.bf16.msra.mxu1 %v551_v15  ;;  %v78_v23 = vld [vmem:[#allocation2 + $0x48] sm:$0xff]  ;;  %v557_v24 = vpack.c.bf16 %v168_v20, %v167_v19  ;;  %v170_v26 = vld [vmem:[#allocation5 + $0x38] sm:$0xff]  ;;  %v79_v28 = vld [vmem:[#allocation2 + $0x50] sm:$0xff]  ;;  %p684_p13 = por %p683_p12, %p682_p11 }
  0x3d   :  { %553 = vmatprep.subr.bf16.mxu1 %v710_v0  ;;  %v539_v27 = vpack.c.bf16 %v78_v23, %v77_v22  ;;  %v80_v29 = vld [vmem:[#allocation2 + $0x58] sm:$0xff]  ;;  %v560_v30 = vpack.c.bf16 %v170_v26, %v169_v25  ;;  %v171_v31 = vld [vmem:[#allocation5 + $0x40] sm:$0xff]  ;;  %v172_v32 = vld [vmem:[#allocation5 + $0x48] sm:$0xff] }
  0x3e   :  { %531 = vmatpush3.bf16.msra.mxu0 %v530_v7  ;;  %v542_v33 = vpack.c.bf16 %v80_v29, %v79_v28  ;;  %v81_v34 = vld [vmem:[#allocation2 + $0x60] sm:$0xff]  ;;  %v82_v35 = vld [vmem:[#allocation2 + $0x68] sm:$0xff]  ;;  %v563_v36 = vpack.c.bf16 %v172_v32, %v171_v31  ;;  %v83_v38 = vld [vmem:[#allocation2 + $0x70] sm:$0xff]  ;;  %p685_p0 = pnand %p684_p13, %p678_p10 }
  0x3f   :  { %532 = vmatprep.subr.bf16.mxu0 %v710_v0  ;;  %v545_v37 = vpack.c.bf16 %v82_v35, %v81_v34  ;;  %v84_v39 = vld [vmem:[#allocation2 + $0x78] sm:$0xff]  ;;  %v68_v41 = vld [vmem:[%s860_s0] sm:$0xff]  ;;  %v173_v42 = vld [vmem:[#allocation5 + $0x50] sm:$0xff] }
  0x40   :  { %555 = vmatpush3.bf16.msra.mxu1 %v554_v18  ;;  %v548_v40 = vpack.c.bf16 %v84_v39, %v83_v38  ;;  %v174_v43 = vld [vmem:[#allocation5 + $0x58] sm:$0xff]  ;;  %v175_v45 = vld [vmem:[#allocation5 + $0x60] sm:$0xff]  ;;  %v176_v46 = vld [vmem:[#allocation5 + $0x68] sm:$0xff] }
  0x41   :  { %556 = vmatprep.subr.bf16.mxu1 %v710_v0  ;;  %v566_v44 = vpack.c.bf16 %v174_v43, %v173_v42  ;;  %v569_v47 = vpack.c.bf16 %v176_v46, %v175_v45  ;;  %v177_v48 = vld [vmem:[#allocation5 + $0x70] sm:$0xff]  ;;  %v178_v49 = vld [vmem:[#allocation5 + $0x78] sm:$0xff]  ;;  %v257_v51 = vld [vmem:[#allocation7] sm:$0xff] }
  0x42   :  { %534 = vmatpush3.bf16.msra.mxu0 %v533_v14  ;;  %v572_v50 = vpack.c.bf16 %v178_v49, %v177_v48  ;;  %v258_v52 = vld [vmem:[#allocation7 + $0x8] sm:$0xff]  ;;  %v259_v53 = vld [vmem:[#allocation7 + $0x10] sm:$0xff]  ;;  %v260_v55 = vld [vmem:[#allocation7 + $0x18] sm:$0xff] }
  0x43   :  { %535 = vmatprep.subr.bf16.mxu0 %v710_v0  ;;  %v575_v54 = vpack.c.bf16 %v258_v52, %v257_v51  ;;  %v578_v56 = vpack.c.bf16 %v260_v55, %v259_v53  ;;  %v261_v57 = vld [vmem:[#allocation7 + $0x20] sm:$0xff]  ;;  %v262_v58 = vld [vmem:[#allocation7 + $0x28] sm:$0xff]  ;;  %v263_v60 = vld [vmem:[#allocation7 + $0x30] sm:$0xff] }
  0x44   :  { %558 = vmatpush3.bf16.msra.mxu1 %v557_v24  ;;  %v581_v59 = vpack.c.bf16 %v262_v58, %v261_v57  ;;  %v264_v61 = vld [vmem:[#allocation7 + $0x38] sm:$0xff]  ;;  %v265_v63 = vld [vmem:[#allocation7 + $0x40] sm:$0xff]  ;;  %v267_v8 = vld [vmem:[#allocation7 + $0x50] sm:$0xff] }
  0x45   :  { %559 = vmatprep.subr.bf16.mxu1 %v710_v0  ;;  %v584_v62 = vpack.c.bf16 %v264_v61, %v263_v60  ;;  %v367_v3 = vld [vmem:[%s862_s2] ss:$0 sm:$0xff]  ;;  %v268_v9 = vld [vmem:[#allocation7 + $0x58] sm:$0xff]  ;;  %v270_v12 = vld [vmem:[#allocation7 + $0x68] sm:$0xff] }
  0x46   :  { %537 = vmatpush3.bf16.msra.mxu0 %v536_v21  ;;  %v590_v10 = vpack.c.bf16 %v268_v9, %v267_v8  ;;  %v269_v11 = vld [vmem:[#allocation7 + $0x60] sm:$0xff]  ;;  %v271_v14 = vld [vmem:[#allocation7 + $0x70] sm:$0xff]  ;;  %v272_v15 = vld [vmem:[#allocation7 + $0x78] sm:$0xff] }
  0x47   :  { %538 = vmatprep.subr.bf16.mxu0 %v710_v0  ;;  %v593_v13 = vpack.c.bf16 %v270_v12, %v269_v11  ;;  %v596_v16 = vpack.c.bf16 %v272_v15, %v271_v14  ;;  %v368_v17 = vld [vmem:[%s864_s4] ss:$0 sm:$0xff] }
  0x48   :  { %561 = vmatpush3.bf16.msra.mxu1 %v560_v30  ;;  %v369_v22 = vld [vmem:[%s866_s6] ss:$0 sm:$0xff] }
  0x49   :  { %562 = vmatprep.subr.bf16.mxu1 %v710_v0 }
  0x4a   :  { %540 = vmatpush3.bf16.msra.mxu0 %v539_v27 }
  0x4b   :  { %541 = vmatprep.subr.bf16.mxu0 %v710_v0 }
  0x4c   :  { %564 = vmatpush3.bf16.msra.mxu1 %v563_v36 }
  0x4d   :  { %565 = vmatprep.subr.bf16.mxu1 %v710_v0 }
  0x4e   :  { %543 = vmatpush3.bf16.msra.mxu0 %v542_v33 }
  0x4f   :  { %544 = vmatprep.subr.bf16.mxu0 %v710_v0 }
  0x50   :  { %567 = vmatpush3.bf16.msra.mxu1 %v566_v44 }
  0x51   :  { %568 = vmatprep.subr.bf16.mxu1 %v710_v0 }
  0x52   :  { %546 = vmatpush3.bf16.msra.mxu0 %v545_v37 }
  0x53   :  { %547 = vmatprep.subr.bf16.mxu0 %v710_v0 }
  0x54   :  { %570 = vmatpush3.bf16.msra.mxu1 %v569_v47 }
  0x55   :  { %571 = vmatprep.subr.bf16.mxu1 %v710_v0 }
  0x56   :  { %549 = vmatpush3.bf16.msra.mxu0 %v548_v40 }
  0x57   :  { %574 = vmatprep.subr.bf16.mxu0 %v710_v0 }
  0x58   :  { %573 = vmatpush3.bf16.msra.mxu1 %v572_v50 }
  0x59   :  { %454 = vmatmul.mubr.f32.vlgmr.msra.gmra.mrb[0].mxu0 %v68_v41 }
  0x5a   :  { %523 = vmatprep.mubr.msk.f32.mxu0 %vm711_vm0, %v712_v1  ;;  %576 = vmatpush3.bf16.msra.mxu0 %v575_v54  ;;  %v266_v1 = vld [vmem:[#allocation7 + $0x48] sm:$0xff] }
  0x5b   :  { %577 = vmatprep.subr.bf16.mxu0 %v710_v0  ;;  %v587_v2 = vpack.c.bf16 %v266_v1, %v265_v63 }
  0x5e   :  { %579 = vmatpush3.bf16.msra.mxu0 %v578_v56 }
  0x5f   :  { %580 = vmatprep.subr.bf16.mxu0 %v710_v0 }
  0x62   :  { %582 = vmatpush3.bf16.msra.mxu0 %v581_v59 }
  0x63   :  { %583 = vmatprep.subr.bf16.mxu0 %v710_v0 }
  0x66   :  { %585 = vmatpush3.bf16.msra.mxu0 %v584_v62 }
  0x67   :  { %586 = vmatprep.subr.bf16.mxu0 %v710_v0 }
  0x6a   :  { %588 = vmatpush3.bf16.msra.mxu0 %v587_v2 }
  0x6b   :  { %589 = vmatprep.subr.bf16.mxu0 %v710_v0 }
  0x6e   :  { %591 = vmatpush3.bf16.msra.mxu0 %v590_v10 }
  0x6f   :  { %592 = vmatprep.subr.bf16.mxu0 %v710_v0 }
  0x72   :  { %594 = vmatpush3.bf16.msra.mxu0 %v593_v13 }
  0x73   :  { %595 = vmatprep.subr.bf16.mxu0 %v710_v0 }
  0x76   :  { %597 = vmatpush3.bf16.msra.mxu0 %v596_v16 }
 0x12c   :  { %v158_v4 = vpop.f32.mrb[0].mxu0 }
 0x12d   :  { %v159_v5 = vadd.f32 %v367_v3, %v158_v4  ;;  %v455_v6 = vpop.f32.mrb[1].mxu0 }
 0x12f   :  { %607 = vtanh.f32 %v159_v5 }
 0x139   :  { %v608_v7 = vpop.eup %607 }
 0x13a   :  { %489 = vmatmul.mubr.f32.vlgmr.msra.gmra.mrb[0].mxu1 %v608_v7 }
 0x20d   :  { %v252_v18 = vpop.f32.mrb[0].mxu1 }
 0x20e   :  { %v253_v19 = vadd.f32 %v368_v17, %v252_v18  ;;  %v490_v20 = vpop.f32.mrb[1].mxu1 }
 0x210   :  { %609 = vtanh.f32 %v253_v19 }
 0x21a   :  { %v610_v21 = vpop.eup %609 }
 0x21b   :  { %524 = vmatmul.mubr.f32.vlgmr.msra.gmra.mrb[2].mxu0 %v610_v21 }
 0x2ee   :  { %v346_v23 = vpop.f32.mrb[2].mxu0 }
 0x2ef   :  { %v347_v24 = vadd.f32 %v369_v22, %v346_v23  ;;  %v525_v0 = vpop.f32.mrb[3].mxu0 }
 0x2f1   :  { %350 = vst [vmem:[#allocation8] sm:$0xff] %v347_v24 }
 0x2f2   :  { %688 = shalt.err (!%p685_p0)
}
 0x2f3   :  { %s689_s23 = scalar_lea.hbm %s867_s7, 128 }
 0x2f4   :  { %p690_p1 = scmp.ne.s32.totalorder %s867_s7, %s689_s23  ;;  %p693_p2 = scmp.lt.u32.totalorder %s689_s23, %s867_s7 }
 0x2f6   :  { %p695_p3 = pnand %p693_p2, %p690_p1 }
 0x2f8   :  { %698 = shalt.err (!%p695_p3)
}
 0x2f9   :  { %360 = dma.vmem_to_hbm [thread:$0]  %s358_s20, 128, %s867_s7, [#allocation4]  }
 0x2fa   :  { %703 = dma.done.wait [#allocation4], 128  }
 0x2fb   :  { %704 = vsyncadd [#allocation4], 4294967168 }
 0x2fc   :  { %364 = vsyncpa [#allocation3], 1 }
 0x2fd   :  { %365 = vsyncpa [#allocation6], 1 }
 0x2fe   :  { %366 = vsyncpa [#allocation4], 1 }

</bundles_post_ra>
